<compile_context>
chip_gen: v6e
topology: v6e:2x2x1
jax: 0.10.0
libtpu: 0.0.40
codegen_flags: <defaults>
</compile_context>

<pallas_src>
import functools
import math

import jax
import jax.numpy as jnp
from jax.experimental import pallas as pl
from jax.experimental.pallas import tpu as pltpu

_LANE = 128
_SUB = 8
_TILE = _SUB * _LANE            # 1024 elements per (8, 128) vreg tile
_MAX_TILES_PER_CHUNK = 256      # 256 tiles * 4 KiB = 1 MiB per f32 input block


def _dice_sums_kernel(x_ref, t_ref, inter_ref, union_ref, *, tc, rem):
    """Accumulate per-batch sum(x*t) and sum(x*x + t*t) partials.

    Block shapes:
      x_ref, t_ref         : (1, tc, 8, 128)  -- one chunk of one batch element
      inter_ref, union_ref : (1, 8, 128)      -- per-batch vreg-shaped partials,
                                                 resident across the chunk axis.
    """
    k = pl.program_id(1)
    nk = pl.num_programs(1)

    @pl.when(k == 0)
    def _():
        inter_ref[...] = jnp.zeros_like(inter_ref)
        union_ref[...] = jnp.zeros_like(union_ref)

    def _accum(n_tiles):
        # Cast happens in VMEM (inputs DMA'd at native width).
        x = x_ref[:, :n_tiles].astype(jnp.float32)
        t = t_ref[:, :n_tiles].astype(jnp.float32)
        # Reduction over the leading tile axis is pure VPU vreg adds; the
        # cross-lane/sublane reduction happens once, in the wrapper.
        inter_ref[...] += jnp.sum(x * t, axis=1)
        union_ref[...] += jnp.sum(x * x + t * t, axis=1)

    if rem == 0:
        _accum(tc)
    else:
        @pl.when(k != nk - 1)
        def _():
            _accum(tc)

        @pl.when(k == nk - 1)
        def _():
            _accum(rem)   # ragged last chunk: only read the valid tiles


@functools.partial(jax.jit, static_argnames=("smooth",))
def dice_loss(inputs, target, smooth=1e-05):
    """Dice loss matching the PyTorch reference (inputs assumed sigmoid-ed)."""
    assert inputs.shape == target.shape
    B = inputs.shape[0]
    n = math.prod(inputs.shape[1:])

    n_pad = ((n + _TILE - 1) // _TILE) * _TILE
    tiles = n_pad // _TILE          # number of (8, 128) vreg tiles per batch element

    def _prep(a):
        a = a.reshape(B, n)
        if n_pad != n:
            # Rare path: n not a multiple of 1024 -> small zero pad (one extra
            # copy). Zeros are neutral for all three sums.
            a = jnp.pad(a, ((0, 0), (0, n_pad - n)))
        # Free (bitcast) reshape when no padding was needed; native dtype kept.
        return a.reshape(B, tiles, _SUB, _LANE)

    x = _prep(inputs)
    t = _prep(target)

    tc = min(_MAX_TILES_PER_CHUNK, tiles)   # tiles per grid chunk
    nk = -(-tiles // tc)                    # number of chunks per batch element
    rem = tiles % tc                        # valid tiles in the last (ragged) chunk

    kernel = functools.partial(_dice_sums_kernel, tc=tc, rem=rem)

    bytes_in = B * n * (inputs.dtype.itemsize + target.dtype.itemsize)
    cost = pl.CostEstimate(
        flops=6 * B * n,
        transcendentals=0,
        bytes_accessed=bytes_in + 2 * B * _SUB * _LANE * 4,
    )

    inter_p, union_p = pl.pallas_call(
        kernel,
        out_shape=(
            jax.ShapeDtypeStruct((B, _SUB, _LANE), jnp.float32),
            jax.ShapeDtypeStruct((B, _SUB, _LANE), jnp.float32),
        ),
        grid_spec=pltpu.PrefetchScalarGridSpec(
            num_scalar_prefetch=0,
            grid=(B, nk),
            in_specs=[
                pl.BlockSpec((1, tc, _SUB, _LANE), lambda b, k: (b, k, 0, 0)),
                pl.BlockSpec((1, tc, _SUB, _LANE), lambda b, k: (b, k, 0, 0)),
            ],
            out_specs=[
                pl.BlockSpec((1, _SUB, _LANE), lambda b, k: (b, 0, 0)),
                pl.BlockSpec((1, _SUB, _LANE), lambda b, k: (b, 0, 0)),
            ],
        ),
        compiler_params=pltpu.CompilerParams(
            dimension_semantics=("parallel", "arbitrary"),
        ),
        cost_estimate=cost,
    )(x, t)

    # Tiny finalize on (B, 8, 128) partials: one XLU-style reduction per batch,
    # exact divide (B divisions total), mean over B.
    inter = jnp.sum(inter_p, axis=(1, 2))
    union = jnp.sum(union_p, axis=(1, 2))
    dice = (2.0 * inter + smooth) / (union + smooth)
    return jnp.mean(1.0 - dice)


def _reference_dice_loss(inputs, target, smooth=1e-05):
    B = inputs.shape[0]
    p = inputs.reshape(B, -1).astype(jnp.float32)
    t = target.reshape(B, -1).astype(jnp.float32)
    inter = jnp.sum(p * t, axis=1)
    union = jnp.sum(p * p, axis=1) + jnp.sum(t * t, axis=1)
    dice = (2.0 * inter + smooth) / (union + smooth)
    return jnp.mean(1.0 - dice)


def _check(shape, key, atol, rtol):
    k1, k2 = jax.random.split(key)
    logits = jax.random.normal(k1, shape, dtype=jnp.float32)
    preds = jax.nn.sigmoid(logits)                     # already-sigmoid "input"
    target = (jax.random.uniform(k2, shape) > 0.5).astype(jnp.float32)

    loss = dice_loss(preds, target)
    jax.block_until_ready(loss)

    ref = _reference_dice_loss(preds, target)
    assert jnp.allclose(loss, ref, atol=atol, rtol=rtol), (shape, loss, ref)


if __name__ == "__main__":
    key = jax.random.PRNGKey(0)
    k1, k2, k3 = jax.random.split(key, 3)

    # Primary case from the spec: B=2, C=4, H=16, W=16 (n = 1024, zero-copy path).
    _check((2, 4, 16, 16), k1, atol=1e-5, rtol=1e-5)

    # Ragged flatten size (n = 300): exercises the (rare) padded wrapper path.
    _check((2, 3, 10, 10), k2, atol=1e-5, rtol=1e-5)

    # Multi-chunk reduction with a ragged last chunk (n = 294912 -> 288 tiles,
    # 2 chunks of 256/32 tiles): exercises the in-kernel pl.when rem branch.
    _check((1, 2, 384, 384), k3, atol=1e-4, rtol=1e-4)

    print("KERNEL_OK")
</pallas_src>

<mosaic_0001>
module attributes {stable_mosaic.version = 11 : i64} {
  func.func @_dice_sums_kernel(%arg0: i32, %arg1: i32, %arg2: memref<1x1x8x128xf32, #tpu.memory_space<vmem>>, %arg3: memref<1x1x8x128xf32, #tpu.memory_space<vmem>>, %arg4: memref<1x8x128xf32, #tpu.memory_space<vmem>>, %arg5: memref<1x8x128xf32, #tpu.memory_space<vmem>>) attributes {dimension_semantics = [#tpu.dimension_semantics<parallel>, #tpu.dimension_semantics<arbitrary>], iteration_bounds = array<i64: 2, 1>, scalar_prefetch = 0 : i64, scratch_operands = 0 : i64, tpu.core_type = #tpu.core_type<tc>, window_params = [{transform_indices = @transform_0, window_bounds = array<i64: 1, 1, 8, 128>}, {transform_indices = @transform_1, window_bounds = array<i64: 1, 1, 8, 128>}, {transform_indices = @transform_2, window_bounds = array<i64: 1, 8, 128>}, {transform_indices = @transform_3, window_bounds = array<i64: 1, 8, 128>}]} {
    %c0_i32 = arith.constant 0 : i32
    %0 = arith.cmpi eq, %arg1, %c0_i32 : i32
    %1 = arith.extui %0 : i1 to i32
    %c0_i32_0 = arith.constant 0 : i32
    %2 = arith.cmpi ne, %1, %c0_i32_0 : i32
    scf.if %2 {
      %cst_21 = arith.constant 0.000000e+00 : f32
      %17 = vector.broadcast %cst_21 : f32 to vector<1x8x128xf32>
      %c0_22 = arith.constant 0 : index
      %c0_23 = arith.constant 0 : index
      %c0_24 = arith.constant 0 : index
      %18 = vector.load %arg4[%c0_22, %c0_23, %c0_24] : memref<1x8x128xf32, #tpu.memory_space<vmem>>, vector<1x8x128xf32>
      tpu.vector_store %arg4[%c0_22, %c0_23, %c0_24], %17 {strides = array<i32>} : memref<1x8x128xf32, #tpu.memory_space<vmem>>, vector<1x8x128xf32>,
      %cst_25 = arith.constant 0.000000e+00 : f32
      %19 = vector.broadcast %cst_25 : f32 to vector<1x8x128xf32>
      %c0_26 = arith.constant 0 : index
      %c0_27 = arith.constant 0 : index
      %c0_28 = arith.constant 0 : index
      %20 = vector.load %arg5[%c0_26, %c0_27, %c0_28] : memref<1x8x128xf32, #tpu.memory_space<vmem>>, vector<1x8x128xf32>
      tpu.vector_store %arg5[%c0_26, %c0_27, %c0_28], %19 {strides = array<i32>} : memref<1x8x128xf32, #tpu.memory_space<vmem>>, vector<1x8x128xf32>,
    } else {
    }
    %c0 = arith.constant 0 : index
    %c0_1 = arith.constant 0 : index
    %c0_2 = arith.constant 0 : index
    %c0_3 = arith.constant 0 : index
    %3 = vector.load %arg2[%c0, %c0_1, %c0_2, %c0_3] : memref<1x1x8x128xf32, #tpu.memory_space<vmem>>, vector<1x1x8x128xf32>
    %c0_4 = arith.constant 0 : index
    %c0_5 = arith.constant 0 : index
    %c0_6 = arith.constant 0 : index
    %c0_7 = arith.constant 0 : index
    %4 = vector.load %arg3[%c0_4, %c0_5, %c0_6, %c0_7] : memref<1x1x8x128xf32, #tpu.memory_space<vmem>>, vector<1x1x8x128xf32>
    %c0_8 = arith.constant 0 : index
    %c0_9 = arith.constant 0 : index
    %c0_10 = arith.constant 0 : index
    %5 = vector.load %arg4[%c0_8, %c0_9, %c0_10] : memref<1x8x128xf32, #tpu.memory_space<vmem>>, vector<1x8x128xf32>
    %6 = arith.mulf %3, %4 : vector<1x1x8x128xf32>
    %cst = arith.constant dense<0.000000e+00> : vector<1x8x128xf32>
    %7 = vector.multi_reduction <add>, %6, %cst [1] : vector<1x1x8x128xf32> to vector<1x8x128xf32>
    %8 = arith.addf %5, %7 : vector<1x8x128xf32>
    %c0_11 = arith.constant 0 : index
    %c0_12 = arith.constant 0 : index
    %c0_13 = arith.constant 0 : index
    %9 = vector.load %arg4[%c0_11, %c0_12, %c0_13] : memref<1x8x128xf32, #tpu.memory_space<vmem>>, vector<1x8x128xf32>
    tpu.vector_store %arg4[%c0_11, %c0_12, %c0_13], %8 {strides = array<i32>} : memref<1x8x128xf32, #tpu.memory_space<vmem>>, vector<1x8x128xf32>,
    %c0_14 = arith.constant 0 : index
    %c0_15 = arith.constant 0 : index
    %c0_16 = arith.constant 0 : index
    %10 = vector.load %arg5[%c0_14, %c0_15, %c0_16] : memref<1x8x128xf32, #tpu.memory_space<vmem>>, vector<1x8x128xf32>
    %11 = arith.mulf %3, %3 : vector<1x1x8x128xf32>
    %12 = arith.mulf %4, %4 : vector<1x1x8x128xf32>
    %13 = arith.addf %11, %12 : vector<1x1x8x128xf32>
    %cst_17 = arith.constant dense<0.000000e+00> : vector<1x8x128xf32>
    %14 = vector.multi_reduction <add>, %13, %cst_17 [1] : vector<1x1x8x128xf32> to vector<1x8x128xf32>
    %15 = arith.addf %10, %14 : vector<1x8x128xf32>
    %c0_18 = arith.constant 0 : index
    %c0_19 = arith.constant 0 : index
    %c0_20 = arith.constant 0 : index
    %16 = vector.load %arg5[%c0_18, %c0_19, %c0_20] : memref<1x8x128xf32, #tpu.memory_space<vmem>>, vector<1x8x128xf32>
    tpu.vector_store %arg5[%c0_18, %c0_19, %c0_20], %15 {strides = array<i32>} : memref<1x8x128xf32, #tpu.memory_space<vmem>>, vector<1x8x128xf32>,
    return
  }
  func.func @transform_0(%arg0: i32, %arg1: i32) -> (i32, i32, i32, i32) {
    %c0_i32 = arith.constant 0 : i32
    %c0_i32_0 = arith.constant 0 : i32
    %c0_i32_1 = arith.constant 0 : i32
    return %arg0, %arg1, %c0_i32, %c0_i32_0 : i32, i32, i32, i32
  }
  func.func @transform_1(%arg0: i32, %arg1: i32) -> (i32, i32, i32, i32) {
    %c0_i32 = arith.constant 0 : i32
    %c0_i32_0 = arith.constant 0 : i32
    %c0_i32_1 = arith.constant 0 : i32
    return %arg0, %arg1, %c0_i32, %c0_i32_0 : i32, i32, i32, i32
  }
  func.func @transform_2(%arg0: i32, %arg1: i32) -> (i32, i32, i32) {
    %c0_i32 = arith.constant 0 : i32
    %c0_i32_0 = arith.constant 0 : i32
    %c0_i32_1 = arith.constant 0 : i32
    return %arg0, %c0_i32, %c0_i32_0 : i32, i32, i32
  }
  func.func @transform_3(%arg0: i32, %arg1: i32) -> (i32, i32, i32) {
    %c0_i32 = arith.constant 0 : i32
    %c0_i32_0 = arith.constant 0 : i32
    %c0_i32_1 = arith.constant 0 : i32
    return %arg0, %c0_i32, %c0_i32_0 : i32, i32, i32
  }
}

</mosaic_0001>

<bundles_post_ra>
// kernel: dice_loss.1
= control target key start
LH: loop header
LB: loop body
LE: loop exit
PB: predicated region body
PF: predicated region fallthrough
CT: control target
= control target key end

     0   :  { %s438_s12 = smov 0   ;;  %s440_s13 = smov 0   ;;  %s465_s0 = inlined_call_operand.vmem [shape: f32[2,1,8,128], index: 0, kind: input, shape index: {}]   ;;  %s466_s1 = inlined_call_operand.vmem [shape: f32[2,1,8,128], index: 1, kind: input, shape index: {}]   ;;  %s467_s2 = inlined_call_operand.vmem [shape: f32[2,8,128], index: 2, kind: output, shape index: {0}]   ;;  %s468_s3 = inlined_call_operand.vmem [shape: f32[2,8,128], index: 3, kind: output, shape index: {1}]  }
   0x1   :  { %s442_s14 = smov 0  }
   0x2 LB: > { %s26_s15 = sadd.s32 1, %s412_s13  ;;  %p362_p0 = scmp.ge.s32.totalorder %s416_s14, 1  ;;  %s416_s14 = sphi %s442_s14, %s14_s14   ;;  %s412_s13 = sphi %s440_s13, %s470_s13   ;;  %s408_s12 = sphi %s438_s12, %s469_s12  }
   0x3   : > { %p28_p1 = scmp.ge.s32.totalorder %s26_s15, 2  ;;  %p170_p2 = scmp.lt.s32.totalorder %s416_s14, 3 }
   0x5   : > { %s472_s15 = smov (%p28_p1, %s26_s15), 0  ;;  %p171_p3 = pnand %p362_p0, %p170_p2 }
   0x6   : > { %p206_p4 = scmp.lt.s32.totalorder (!%p171_p3), %s408_s12, 1 }
   0x7   : > { %174 = sbr.rel (%p171_p3) target bundleno = 22 (0x16), region = 28 }
   0xc   : > { %s474_s12 = smov (!%p206_p4, %s408_s12), 1 }
   0xd   : > { %s363_s16 = sshll.u32 %s474_s12, 3 }
   0xe   : > { %s212_s19 = scalar_lea.vmem %s465_s0, %s363_s16  ;;  %s219_s22 = scalar_lea.vmem %s466_s1, %s363_s16 }
   0xf   : > { %v234_v0 = vld [vmem:[%s212_s19] sm:$0xff]  ;;  %s223_s25 = scalar_lea.vmem %s467_s2, %s363_s16  ;;  %s227_s28 = scalar_lea.vmem %s468_s3, %s363_s16 }
  0x10   : > { %v235_v1 = vld [vmem:[%s219_s22] sm:$0xff]  ;;  %v242_v3 = vmul.f32 %v234_v0, %v234_v0 }
  0x11   : > { %v237_v2 = vmul.f32 %v235_v1, %v234_v0  ;;  %v243_v4 = vmul.f32 %v235_v1, %v235_v1 }
  0x13   : > { %v244_v5 = vadd.f32 %v243_v4, %v242_v3  ;;  %240 = vst [vmem:[%s223_s25] sm:$0xff] %v237_v2 }
  0x15   : > { %247 = vst [vmem:[%s227_s28] sm:$0xff] %v244_v5 }
  0x16 PF: > { %s14_s14 = sadd.s32 1, %s416_s14   ;;  %s469_s12 = smov %s412_s13 }
  0x17   : > { %p11_p5 = scmp.ge.s32.totalorder %s14_s14, 4   ;;  %s470_s13 = smov %s472_s15 }
  0x19   :  { %13 = sbr.rel (!%p11_p5) target bundleno = 2 (0x2), region = 77 }

</bundles_post_ra>
